<compile_context>
chip_gen: v7x
topology: tpu7x:2x2x1
jax: 0.10.0
libtpu: 0.0.40
codegen_flags: <defaults>
</compile_context>

<pallas_src>
import functools
import math

import jax
import jax.numpy as jnp
from jax.experimental import pallas as pl
from jax.experimental.pallas import tpu as pltpu

# ----------------------------- config (BertConfig defaults, shrunk depth) ----
HIDDEN = 768            # classifier in the PyTorch module hard-codes 768
NUM_HEADS = 12
HEAD_DIM = HIDDEN // NUM_HEADS          # 64
INTERMEDIATE = 3072
NUM_LAYERS = 2          # BertConfig default is 12; shrunk for a small demo
MAX_POS = 64
LN_EPS = 1e-12
MASK_MIN = float(jnp.finfo(jnp.float32).min)   # HF: (1 - mask) * finfo.min
VMEM_LIMIT = 48 * 1024 * 1024                  # <= 48 MiB: safe on v7x (64 MiB/TC)


def _pick_tile(dim, cap, mult):
    """Largest tile <= cap that divides dim and is a multiple of mult
    (falls back to the full dim, which is always legal)."""
    if dim <= cap:
        return dim
    t = (cap // mult) * mult
    while t >= mult:
        if dim % t == 0:
            return t
        t -= mult
    return dim


def _pick_parallel_tile(dim, cap, mult):
    """Like _pick_tile, but prefers >= 2 grid steps along a parallel axis so
    both v7x TensorCores get work (no effect on v5e/v6e)."""
    cap = min(cap, dim)
    if dim >= 2 * mult:
        cap = min(cap, dim // 2)
    cap = max(cap, mult)
    return _pick_tile(dim, cap, mult)


# TODO(synk): HF BERT uses exact erf-GELU; a tanh-approximation is used here so
# the activation lowers cleanly to the EUP inside the matmul epilogue.
_GELU_C = math.sqrt(2.0 / math.pi)


def _gelu_tanh(x):
    return 0.5 * x * (1.0 + jnp.tanh(_GELU_C * (x + 0.044715 * x * x * x)))


# ----------------------------- dense matmul (+bias, +optional GELU) ----------
def _matmul_bias_kernel(x_ref, w_ref, b_ref, o_ref, acc_ref, *, activation):
    # Bias initializes the f32 accumulator at k==0 (no epilogue bias add).
    @pl.when(pl.program_id(2) == 0)
    def _():
        acc_ref[...] = jnp.broadcast_to(b_ref[...], acc_ref.shape)

    acc_ref[...] += jnp.dot(x_ref[...], w_ref[...],
                            preferred_element_type=jnp.float32)

    @pl.when(pl.program_id(2) == pl.num_programs(2) - 1)
    def _():
        y = acc_ref[...]
        if activation == "gelu":
            y = _gelu_tanh(y)
        o_ref[...] = y.astype(o_ref.dtype)


def matmul_bias(x, w, b, activation=None, out_dtype=jnp.bfloat16,
                tm_cap=256, tn_cap=512, tk_cap=1536):
    """y = act(x @ w + b); x bf16, w bf16, f32 accumulate in VMEM scratch."""
    M, K = x.shape
    K2, N = w.shape
    assert K == K2
    tm = _pick_parallel_tile(M, tm_cap, 8)
    tn = _pick_tile(N, tn_cap, 128)
    tk = _pick_tile(K, tk_cap, 128)
    return pl.pallas_call(
        functools.partial(_matmul_bias_kernel, activation=activation),
        out_shape=jax.ShapeDtypeStruct((M, N), out_dtype),
        grid_spec=pltpu.PrefetchScalarGridSpec(
            num_scalar_prefetch=0,
            grid=(M // tm, N // tn, K // tk),
            in_specs=[
                pl.BlockSpec((tm, tk), lambda i, j, k: (i, k)),
                pl.BlockSpec((tk, tn), lambda i, j, k: (k, j)),
                pl.BlockSpec((1, tn), lambda i, j, k: (0, j)),
            ],
            out_specs=pl.BlockSpec((tm, tn), lambda i, j, k: (i, j)),
            scratch_shapes=[pltpu.VMEM((tm, tn), jnp.float32)]),
        compiler_params=pltpu.CompilerParams(
            dimension_semantics=("parallel", "parallel", "arbitrary"),
            vmem_limit_bytes=VMEM_LIMIT),
    )(x.astype(jnp.bfloat16), w.astype(jnp.bfloat16),
      b.reshape(1, N).astype(jnp.float32))


# -------------------- matmul + bias + residual-add + LayerNorm (fused) -------
def _matmul_bias_res_ln_kernel(x_ref, w_ref, b_ref, r_ref, g_ref, bb_ref,
                               o_ref, acc_ref, *, eps):
    @pl.when(pl.program_id(1) == 0)
    def _():
        acc_ref[...] = jnp.broadcast_to(b_ref[...], acc_ref.shape)

    acc_ref[...] += jnp.dot(x_ref[...], w_ref[...],
                            preferred_element_type=jnp.float32)

    @pl.when(pl.program_id(1) == pl.num_programs(1) - 1)
    def _():
        y = acc_ref[...] + r_ref[...].astype(jnp.float32)
        mu = jnp.mean(y, axis=-1, keepdims=True)
        yc = y - mu
        var = jnp.mean(yc * yc, axis=-1, keepdims=True)
        inv = jax.lax.rsqrt(var + eps)
        o_ref[...] = (yc * inv * g_ref[...] + bb_ref[...]).astype(o_ref.dtype)


def matmul_bias_res_ln(x, w, b, residual, gamma, beta, eps=LN_EPS,
                       tm_cap=256, tk_cap=1536):
    """LayerNorm(x @ w + b + residual) * gamma + beta, all fused.
    N (=768) is kept whole so the row-wise LN can run in the epilogue."""
    M, K = x.shape
    K2, N = w.shape
    assert K == K2 and residual.shape == (M, N)
    tm = _pick_parallel_tile(M, tm_cap, 8)
    tk = _pick_tile(K, tk_cap, 128)
    return pl.pallas_call(
        functools.partial(_matmul_bias_res_ln_kernel, eps=eps),
        out_shape=jax.ShapeDtypeStruct((M, N), jnp.bfloat16),
        grid_spec=pltpu.PrefetchScalarGridSpec(
            num_scalar_prefetch=0,
            grid=(M // tm, K // tk),
            in_specs=[
                pl.BlockSpec((tm, tk), lambda i, k: (i, k)),   # x
                pl.BlockSpec((tk, N), lambda i, k: (k, 0)),    # w
                pl.BlockSpec((1, N), lambda i, k: (0, 0)),     # bias
                pl.BlockSpec((tm, N), lambda i, k: (i, 0)),    # residual
                pl.BlockSpec((1, N), lambda i, k: (0, 0)),     # gamma
                pl.BlockSpec((1, N), lambda i, k: (0, 0)),     # beta
            ],
            out_specs=pl.BlockSpec((tm, N), lambda i, k: (i, 0)),
            scratch_shapes=[pltpu.VMEM((tm, N), jnp.float32)]),
        compiler_params=pltpu.CompilerParams(
            dimension_semantics=("parallel", "arbitrary"),
            vmem_limit_bytes=VMEM_LIMIT),
    )(x.astype(jnp.bfloat16), w.astype(jnp.bfloat16),
      b.reshape(1, N).astype(jnp.float32), residual.astype(jnp.bfloat16),
      gamma.reshape(1, N).astype(jnp.float32),
      beta.reshape(1, N).astype(jnp.float32))


# ----------------------------- LayerNorm (embeddings, no residual) -----------
def _ln_kernel(x_ref, g_ref, b_ref, o_ref, *, eps):
    x = x_ref[...].astype(jnp.float32)
    mu = jnp.mean(x, axis=-1, keepdims=True)
    xc = x - mu
    var = jnp.mean(xc * xc, axis=-1, keepdims=True)
    inv = jax.lax.rsqrt(var + eps)
    o_ref[...] = (xc * inv * g_ref[...] + b_ref[...]).astype(o_ref.dtype)


def layernorm(x, gamma, beta, eps=LN_EPS, tm_cap=512):
    M, H = x.shape
    tm = _pick_parallel_tile(M, tm_cap, 8)
    row_spec = pl.BlockSpec((tm, H), lambda i: (i, 0))
    vec_spec = pl.BlockSpec((1, H), lambda i: (0, 0))
    return pl.pallas_call(
        functools.partial(_ln_kernel, eps=eps),
        out_shape=jax.ShapeDtypeStruct((M, H), jnp.bfloat16),
        grid=(M // tm,),
        in_specs=[row_spec, vec_spec, vec_spec],
        out_specs=row_spec,
        compiler_params=pltpu.CompilerParams(
            dimension_semantics=("parallel",),
            vmem_limit_bytes=VMEM_LIMIT),
    )(x, gamma.reshape(1, H).astype(jnp.float32),
      beta.reshape(1, H).astype(jnp.float32))


# ----------------------------- self-attention ---------------------------------
def _attention_kernel(qkv_ref, m_ref, o_ref, *, scale):
    m = m_ref[0]                                   # (1, S) additive key bias
    outs = []
    # All 12 heads in one body (grid is just (B,)): mask loaded once, per-head
    # slices read straight from the packed bf16 QKV slab in VMEM.
    # Note: per-head (S,64) matmuls under-fill the 256-wide MXU on v6e/v7x,
    # but at S<=64 attention is overhead-, not FLOP-, bound.
    for h in range(NUM_HEADS):
        q = qkv_ref[0, :, h * HEAD_DIM:(h + 1) * HEAD_DIM]               # (S,64)
        k = qkv_ref[0, :, HIDDEN + h * HEAD_DIM:HIDDEN + (h + 1) * HEAD_DIM]
        v = qkv_ref[0, :, 2 * HIDDEN + h * HEAD_DIM:2 * HIDDEN + (h + 1) * HEAD_DIM]
        s = jax.lax.dot_general(q, k, (((1,), (1,)), ((), ())),
                                preferred_element_type=jnp.float32) * scale
        s = s + m                                  # (S,S) + (1,S)
        s = s - jnp.max(s, axis=-1, keepdims=True)
        p = jnp.exp(s)
        p = p * pl.reciprocal(jnp.sum(p, axis=-1, keepdims=True), approx=True)
        outs.append(jnp.dot(p.astype(jnp.bfloat16), v,
                            preferred_element_type=jnp.float32))
    # single 768-lane dense store per batch element
    o_ref[0] = jnp.concatenate(outs, axis=-1).astype(o_ref.dtype)


def attention(qkv, mask_bias):
    """qkv: (B, S, 3*HIDDEN) packed [q|k|v] bf16; mask_bias: (B, 1, S) additive.
    Output: (B, S, HIDDEN) bf16 context, head h at columns h*64:(h+1)*64."""
    B, S, _ = qkv.shape
    scale = 1.0 / math.sqrt(HEAD_DIM)
    return pl.pallas_call(
        functools.partial(_attention_kernel, scale=scale),
        out_shape=jax.ShapeDtypeStruct((B, S, HIDDEN), jnp.bfloat16),
        grid=(B,),
        in_specs=[
            pl.BlockSpec((1, S, 3 * HIDDEN), lambda b: (b, 0, 0)),
            pl.BlockSpec((1, 1, S), lambda b: (b, 0, 0)),
        ],
        out_specs=pl.BlockSpec((1, S, HIDDEN), lambda b: (b, 0, 0)),
        compiler_params=pltpu.CompilerParams(
            dimension_semantics=("parallel",),
            vmem_limit_bytes=VMEM_LIMIT),
    )(qkv, mask_bias)


# ----------------------------- GAP + classifier --------------------------------
def _gap_classifier_kernel(h_ref, w_ref, b_ref, o_ref, *, inv_s):
    gap = jnp.sum(h_ref[...].astype(jnp.float32), axis=1) * inv_s   # (tb, H)
    o_ref[...] = (jnp.dot(gap.astype(jnp.bfloat16), w_ref[...],
                          preferred_element_type=jnp.float32)
                  + b_ref[...]).astype(o_ref.dtype)


def gap_classifier(hidden, w, b, tb_cap=8):
    """hidden: (B, S, H) bf16 -> logits (B, num_labels), fused GAP + Linear.
    Batch-tiled; logits computed into a 128-wide lane slab and sliced."""
    B, S, H = hidden.shape
    N = w.shape[1]
    npad = ((N + 127) // 128) * 128
    w_p = jnp.zeros((H, npad), jnp.bfloat16).at[:, :N].set(w.astype(jnp.bfloat16))
    b_p = jnp.zeros((1, npad), jnp.float32).at[:, :N].set(b.astype(jnp.float32))
    tb = _pick_parallel_tile(B, tb_cap, 1)
    out = pl.pallas_call(
        functools.partial(_gap_classifier_kernel, inv_s=1.0 / S),
        out_shape=jax.ShapeDtypeStruct((B, npad), jnp.float32),
        grid=(B // tb,),
        in_specs=[
            pl.BlockSpec((tb, S, H), lambda i: (i, 0, 0)),
            pl.BlockSpec((H, npad), lambda i: (0, 0)),
            pl.BlockSpec((1, npad), lambda i: (0, 0)),
        ],
        out_specs=pl.BlockSpec((tb, npad), lambda i: (i, 0)),
        compiler_params=pltpu.CompilerParams(
            dimension_semantics=("parallel",),
            vmem_limit_bytes=VMEM_LIMIT),
    )(hidden.astype(jnp.bfloat16), w_p, b_p)
    return out[:, :N]


# ----------------------------- parameters ------------------------------------
def init_params(key, vocab_size, num_labels):
    std = 0.02
    keys = jax.random.split(key, 4 + NUM_LAYERS)

    def normal(k, shape, dtype=jnp.float32):
        return (jax.random.normal(k, shape, jnp.float32) * std).astype(dtype)

    params = {
        "word_emb": normal(keys[0], (vocab_size, HIDDEN)),
        "pos_emb": normal(keys[1], (MAX_POS, HIDDEN)),
        "type_emb": normal(keys[2], (2, HIDDEN)),
        "emb_ln_g": jnp.ones((HIDDEN,), jnp.float32),
        "emb_ln_b": jnp.zeros((HIDDEN,), jnp.float32),
        "cls_w": normal(keys[3], (HIDDEN, num_labels), jnp.bfloat16),
        "cls_b": jnp.zeros((num_labels,), jnp.float32),
        "layers": [],
    }
    for l in range(NUM_LAYERS):
        lk = jax.random.split(keys[4 + l], 6)
        wq = normal(lk[0], (HIDDEN, HIDDEN), jnp.bfloat16)
        wk = normal(lk[1], (HIDDEN, HIDDEN), jnp.bfloat16)
        wv = normal(lk[2], (HIDDEN, HIDDEN), jnp.bfloat16)
        params["layers"].append({
            # fused QKV projection: one (768, 2304) matmul instead of three
            "w_qkv": jnp.concatenate([wq, wk, wv], axis=1),
            "b_qkv": jnp.zeros((3 * HIDDEN,), jnp.float32),
            "wo": normal(lk[3], (HIDDEN, HIDDEN), jnp.bfloat16),
            "bo": jnp.zeros((HIDDEN,), jnp.float32),
            "ln1_g": jnp.ones((HIDDEN,), jnp.float32),
            "ln1_b": jnp.zeros((HIDDEN,), jnp.float32),
            "w1": normal(lk[4], (HIDDEN, INTERMEDIATE), jnp.bfloat16),
            "b1": jnp.zeros((INTERMEDIATE,), jnp.float32),
            "w2": normal(lk[5], (INTERMEDIATE, HIDDEN), jnp.bfloat16),
            "b2": jnp.zeros((HIDDEN,), jnp.float32),
            "ln2_g": jnp.ones((HIDDEN,), jnp.float32),
            "ln2_b": jnp.zeros((HIDDEN,), jnp.float32),
        })
    return params


# ----------------------------- forward pass ----------------------------------
def barcode_bert_forward(params, input_ids, attention_mask=None, labels=None):
    B, S = input_ids.shape
    H = HIDDEN
    if attention_mask is None:
        attention_mask = jnp.ones((B, S), jnp.float32)
    # HF extended attention mask: (1 - mask) * finfo.min, added to the scores.
    mask_bias = ((1.0 - attention_mask.astype(jnp.float32)) * MASK_MIN
                 ).reshape(B, 1, S)

    # --- BertEmbeddings (gather glue in JAX; LayerNorm in Pallas, no residual)
    emb = (params["word_emb"][input_ids]
           + params["pos_emb"][:S][None, :, :]
           + params["type_emb"][0][None, None, :])
    x = layernorm(emb.reshape(B * S, H),
                  params["emb_ln_g"], params["emb_ln_b"])       # (B*S, H) bf16

    hidden_states = [x.reshape(B, S, H)]

    for layer in params["layers"]:
        # --- self-attention (fused QKV projection, bf16 activations) ---
        qkv = matmul_bias(x, layer["w_qkv"], layer["b_qkv"])       # (B*S, 2304)
        ctx = attention(qkv.reshape(B, S, 3 * H), mask_bias)       # (B, S, 768)
        # wo projection + bias + residual-add + LayerNorm fused in one kernel
        x = matmul_bias_res_ln(ctx.reshape(B * S, H), layer["wo"], layer["bo"],
                               residual=x, gamma=layer["ln1_g"],
                               beta=layer["ln1_b"])

        # --- feed-forward: GELU fused in FFN-up epilogue; FFN-down fused with
        #     bias + residual-add + LayerNorm ---
        ffn = matmul_bias(x, layer["w1"], layer["b1"], activation="gelu")
        x = matmul_bias_res_ln(ffn, layer["w2"], layer["b2"],
                               residual=x, gamma=layer["ln2_g"],
                               beta=layer["ln2_b"])

        hidden_states.append(x.reshape(B, S, H))

    # outputs.hidden_states[-1] -> mean over seq (plain .mean(1), incl. padded
    # positions, as in the PyTorch reference) -> Linear(768, num_labels)
    last_hidden = hidden_states[-1]                     # (B, S, 768) bf16
    logits = gap_classifier(last_hidden, params["cls_w"], params["cls_b"])

    loss = None
    if labels is not None:
        logp = jax.nn.log_softmax(logits, axis=-1)
        loss = -jnp.mean(jnp.take_along_axis(logp, labels[:, None], axis=-1))

    return {"loss": loss, "logits": logits,
            "hidden_states": tuple(hidden_states)}


# ----------------------------- demo -------------------------------------------
if __name__ == "__main__":
    key = jax.random.PRNGKey(0)
    pkey, ikey = jax.random.split(key)

    B, S = 2, 16
    vocab_size = 32
    num_labels = 10

    params = init_params(pkey, vocab_size, num_labels)
    input_ids = jax.random.randint(ikey, (B, S), 0, vocab_size, dtype=jnp.int32)
    attention_mask = jnp.ones((B, S), jnp.float32).at[1, S - 4:].set(0.0)
    labels = jnp.array([1, 3], dtype=jnp.int32)

    out = barcode_bert_forward(params, input_ids, attention_mask, labels)
    jax.block_until_ready(out["logits"])
    jax.block_until_ready(out["loss"])

    assert out["logits"].shape == (B, num_labels)
    assert out["hidden_states"][-1].shape == (B, S, HIDDEN)
    assert bool(jnp.isfinite(out["loss"]))
    print("KERNEL_OK")
</pallas_src>

<mosaic_0001>
module attributes {stable_mosaic.version = 11 : i64} {
  func.func @_ln_kernel(%arg0: i32, %arg1: memref<16x768xf32, #tpu.memory_space<vmem>>, %arg2: memref<1x768xf32, #tpu.memory_space<vmem>>, %arg3: memref<1x768xf32, #tpu.memory_space<vmem>>, %arg4: memref<16x768xbf16, #tpu.memory_space<vmem>>) attributes {dimension_semantics = [#tpu.dimension_semantics<parallel>], iteration_bounds = array<i64: 2>, scalar_prefetch = 0 : i64, scratch_operands = 0 : i64, tpu.core_type = #tpu.core_type<tc>, window_params = [{transform_indices = @transform_0, window_bounds = array<i64: 16, 768>}, {pipeline_mode = #tpu.pipeline_mode<synchronous>, transform_indices = @transform_1, window_bounds = array<i64: 1, 768>}, {pipeline_mode = #tpu.pipeline_mode<synchronous>, transform_indices = @transform_2, window_bounds = array<i64: 1, 768>}, {transform_indices = @transform_3, window_bounds = array<i64: 16, 768>}]} {
    %c0 = arith.constant 0 : index
    %c0_0 = arith.constant 0 : index
    %0 = vector.load %arg1[%c0, %c0_0] : memref<16x768xf32, #tpu.memory_space<vmem>>, vector<16x768xf32>
    %cst = arith.constant dense<0.000000e+00> : vector<16xf32>
    %1 = vector.multi_reduction <add>, %0, %cst [1] : vector<16x768xf32> to vector<16xf32>
    %2 = vector.shape_cast %1 : vector<16xf32> to vector<16x1xf32>
    %cst_1 = arith.constant 7.680000e+02 : f32
    %3 = vector.broadcast %cst_1 : f32 to vector<16x1xf32>
    %4 = arith.divf %2, %3 : vector<16x1xf32>
    %5 = vector.broadcast %4 : vector<16x1xf32> to vector<16x768xf32>
    %6 = arith.subf %0, %5 : vector<16x768xf32>
    %7 = arith.mulf %6, %6 : vector<16x768xf32>
    %cst_2 = arith.constant dense<0.000000e+00> : vector<16xf32>
    %8 = vector.multi_reduction <add>, %7, %cst_2 [1] : vector<16x768xf32> to vector<16xf32>
    %9 = vector.shape_cast %8 : vector<16xf32> to vector<16x1xf32>
    %cst_3 = arith.constant 7.680000e+02 : f32
    %10 = vector.broadcast %cst_3 : f32 to vector<16x1xf32>
    %11 = arith.divf %9, %10 : vector<16x1xf32>
    %cst_4 = arith.constant 9.99999996E-13 : f32
    %12 = vector.broadcast %cst_4 : f32 to vector<16x1xf32>
    %13 = arith.addf %11, %12 : vector<16x1xf32>
    %14 = math.rsqrt %13 : vector<16x1xf32>
    %15 = vector.broadcast %14 : vector<16x1xf32> to vector<16x768xf32>
    %16 = arith.mulf %6, %15 : vector<16x768xf32>
    %c0_5 = arith.constant 0 : index
    %c0_6 = arith.constant 0 : index
    %17 = vector.load %arg2[%c0_5, %c0_6] : memref<1x768xf32, #tpu.memory_space<vmem>>, vector<1x768xf32>
    %18 = vector.broadcast %17 : vector<1x768xf32> to vector<16x768xf32>
    %19 = arith.mulf %16, %18 : vector<16x768xf32>
    %c0_7 = arith.constant 0 : index
    %c0_8 = arith.constant 0 : index
    %20 = vector.load %arg3[%c0_7, %c0_8] : memref<1x768xf32, #tpu.memory_space<vmem>>, vector<1x768xf32>
    %21 = vector.broadcast %20 : vector<1x768xf32> to vector<16x768xf32>
    %22 = arith.addf %19, %21 : vector<16x768xf32>
    %23 = arith.truncf %22 : vector<16x768xf32> to vector<16x768xbf16>
    %c0_9 = arith.constant 0 : index
    %c0_10 = arith.constant 0 : index
    %24 = vector.load %arg4[%c0_9, %c0_10] : memref<16x768xbf16, #tpu.memory_space<vmem>>, vector<16x768xbf16>
    tpu.vector_store %arg4[%c0_9, %c0_10], %23 {strides = array<i32>} : memref<16x768xbf16, #tpu.memory_space<vmem>>, vector<16x768xbf16>,
    return
  }
  func.func @transform_0(%arg0: i32) -> (i32, i32) {
    %c0_i32 = arith.constant 0 : i32
    %c0_i32_0 = arith.constant 0 : i32
    return %arg0, %c0_i32 : i32, i32
  }
  func.func @transform_1(%arg0: i32) -> (i32, i32) {
    %c0_i32 = arith.constant 0 : i32
    %c0_i32_0 = arith.constant 0 : i32
    %c0_i32_1 = arith.constant 0 : i32
    return %c0_i32, %c0_i32_0 : i32, i32
  }
  func.func @transform_2(%arg0: i32) -> (i32, i32) {
    %c0_i32 = arith.constant 0 : i32
    %c0_i32_0 = arith.constant 0 : i32
    %c0_i32_1 = arith.constant 0 : i32
    return %c0_i32, %c0_i32_0 : i32, i32
  }
  func.func @transform_3(%arg0: i32) -> (i32, i32) {
    %c0_i32 = arith.constant 0 : i32
    %c0_i32_0 = arith.constant 0 : i32
    return %arg0, %c0_i32 : i32, i32
  }
}

</mosaic_0001>

<bundles_post_ra>
// kernel: tpu_custom_call.1
= control target key start
LH: loop header
LB: loop body
LE: loop exit
PB: predicated region body
PF: predicated region fallthrough
CT: control target
= control target key end

     0   :  { %8 = vsyncpa [#allocation3], 0  ;;  %s1018_s0 = inlined_call_operand.hbm [shape: f32[32,768], index: 0, kind: input, shape index: {}]   ;;  %s1019_s1 = inlined_call_operand.hbm [shape: f32[1,768], index: 1, kind: input, shape index: {}]   ;;  %s1020_s2 = inlined_call_operand.vmem [shape: f32[1,768], index: 2, kind: input, shape index: {}]   ;;  %s1021_s3 = inlined_call_operand.hbm [shape: bf16[32,768], index: 3, kind: output, shape index: {}]  }
   0x1   :  { %10 = vsyncpa [#allocation3 + $0x1], 0 }
   0x2   :  { %11 = vsyncpa [#allocation6], 0 }
   0x3   :  { %12 = vsyncpa [#allocation4], 0 }
   0x4   :  { %14 = vsyncpa [#allocation4 + $0x1], 0  ;;  %s771_s12 = smov 0   ;;  %s773_s13 = smov 0  }
   0x5   :  { %s775_s14 = smov 0   ;;  %s777_s15 = smov 0  }
   0x6 LB: > { %s792_s16 = sadd.s32 4294967295, %s742_s15   ;;  %s518_s17 = sadd.s32 4294967294, %s742_s15   ;;  %s742_s15 = sphi %s777_s15, %s1046_s15   ;;  %s738_s14 = sphi %s775_s14, %s1045_s14   ;;  %s734_s13 = sphi %s773_s13, %s1044_s13   ;;  %s730_s12 = sphi %s771_s12, %s1043_s12  }
   0x7   : > { %s796_s18 = sadd.s32 1, %s742_s15   ;;  %s27_s19 = sadd.s32 1, %s738_s14 }
   0x8   : > { %s24_s20 = ssub.s32 %s742_s15, %s796_s18  ;;  %p34_p0 = scmp.ne.s32.totalorder %s738_s14, %s734_s13 }
   0x9   : > { %p25_p1 = scmp.eq.s32.totalorder %s24_s20, 0  ;;  %p35_p2 = scmp.eq.s32.totalorder %s742_s15, 0 }
   0xa   : > { %p40_p3 = scmp.ne.s32.totalorder %s734_s13, %s730_s12  ;;  %p1022_p4 = scmp.eq.s32.totalorder %s792_s16, 0 }
   0xb   : > { %s808_s21 = scalar_select %p25_p1, %s738_s14, %s27_s19  }
   0xc   : > { %p810_p5 = por %p35_p2, %p34_p0  ;;  %p816_p6 = por %p1022_p4, %p40_p3 }
   0xd   : > { %p106_p7 = scmp.eq.s32.totalorder %s792_s16, 1  ;;  %p112_p8 = scmp.eq.s32.totalorder %s518_s17, 1 }
   0xe   : > { %s1028_s23 = scalar_select %p816_p6, 1, 0 }
   0xf   : > { %p519_p9 = scmp.ge.s32.totalorder %s742_s15, 1  ;;  %p119_p10 = scmp.lt.s32.totalorder %s742_s15, 3 }
  0x10   : > { %p823_p11 = por %p106_p7, %p34_p0  ;;  %p827_p12 = por %p112_p8, %p40_p3 }
  0x11   : > { %p831_p13 = pnand %p519_p9, %p119_p10  ;;  %s744_s27 = smov [#allocation5]  }
  0x12   : > { %s1029_s24 = scalar_select %p823_p11, 1, 0 }
  0x13   : > { %s1030_s25 = scalar_select %p827_p12, 1, 0 }
  0x14   : > { %s1031_s26 = scalar_select %p831_p13, 1, 0 }
  0x15   : > { %p557_p2 = pneg %p831_p13  ;;  %s132_s28 = sshll.u32 %s744_s27, 4  ;;  %s133_s28 = int_to_ptr.vmem [resolvable:$true] %s132_s28 }
  0x16   : > { %p570_p4 = scmp.lt.s32.totalorder %s742_s15, 2  ;;  %p1032_p0 = scmp.eq.s32.totalorder %s792_s16, 0 }
  0x17   : > { %s146_s30 = sand.u32 1, %s738_s14   ;;  %s614_s8 = scalar_lea.hbm %s1019_s1, 96 }
  0x18   : > { %p841_p7 = pnand %p557_p2, %p1032_p0  ;;  %p848_p3 = pnand %p570_p4, %p810_p5 }
  0x19   : > { %s544_s5 = smul.u32 96, %s146_s30  ;;  %p615_p8 = scmp.ne.s32.totalorder %s1019_s1, %s614_s8 }
  0x1a   : > { %s1034_s4 = scalar_select %p848_p3, 1, 0 }
  0x1b   : > { %p616_p9 = pneg %p841_p7  ;;  %p621_p4 = scmp.lt.u32.totalorder %s614_s8, %s1019_s1 }
  0x1d   : > { %p617_p10 = pnand %p616_p9, %p615_p8 }
  0x1f   : > { %p618_p2 = pneg %p617_p10 }
  0x21   : > { %p623_p5 = pnand %p621_p4, %p618_p2 }
  0x23   : > { %626 = shalt.err (!%p623_p5)
}
  0x24   : > { %s627_s19 = scalar_lea.vmem %s133_s28, 96  ;;  %p635_p11 = scmp.lt.s32.totalorder %s133_s28, %s133_s28 }
  0x25   : > { %p628_p0 = scmp.ne.s32.totalorder %s133_s28, %s627_s19  ;;  %p636_p6 = scmp.lt.s32.totalorder %s627_s19, %s627_s19 }
  0x27   : > { %p630_p1 = pnand %p628_p0, %p616_p9  ;;  %p637_p13 = por %p636_p6, %p635_p11 }
  0x29   : > { %p631_p12 = pneg %p630_p1 }
  0x2b   : > { %p638_p3 = pnand %p637_p13, %p631_p12 }
  0x2d   : > { %641 = shalt.err (!%p638_p3)
}
  0x2e   : > { %560 = dma.hbm_to_vmem [thread:$0]  (!%p841_p7), %s1019_s1, 96, %s133_s28, [#allocation6]  }
  0x2f   : > { %s545_s27 = smul.u32 1536, %s742_s15  ;;  %s150_s6 = scalar_lea.vmem [#allocation2], %s544_s5 }
  0x30   : > { %s158_s7 = sshll.u32 %s150_s6, 4  ;;  %s876_s29 = scalar_lea.sflag [#allocation3], %s146_s30  ;;  %s869_s7 = int_to_ptr.vmem [resolvable:$true] %s158_s7 }
  0x31   : > { %s874_s10 = scalar_lea.hbm %s1018_s0, %s545_s27  ;;  %p1035_p11 = scmp.ne.s32.totalorder %s1034_s4, 0 }
  0x32   : > { %s642_s11 = scalar_lea.hbm %s874_s10, 1536  ;;  %s647_s17 = scalar_lea.hbm %s1018_s0, 3072 }
  0x33   : > { %p643_p6 = scmp.ne.s32.totalorder %s874_s10, %s642_s11  ;;  %p644_p12 = pneg %p1035_p11 }
  0x34   : > { %p648_p7 = scmp.lt.u32.totalorder %s874_s10, %s1018_s0  ;;  %p649_p3 = scmp.lt.u32.totalorder %s647_s17, %s642_s11 }
  0x35   : > { %p645_p13 = pnand %p644_p12, %p643_p6  ;;  %p651_p9 = scmp.lt.u32.totalorder %s642_s11, %s874_s10 }
  0x36   : > { %p650_p8 = por %p649_p3, %p648_p7 }
  0x37   : > { %p646_p1 = pneg %p645_p13 }
  0x38   : > { %p652_p10 = por %p651_p9, %p650_p8 }
  0x3a   : > { %p653_p2 = pnand %p652_p10, %p646_p1 }
  0x3c   : > { %656 = shalt.err (!%p653_p2)
}
  0x3d   : > { %s657_s30 = scalar_lea.vmem %s869_s7, 1536  ;;  %s745_s22 = smov [#allocation2]  }
  0x3e   : > { %p658_p4 = scmp.ne.s32.totalorder %s869_s7, %s657_s30  ;;  %s662_s27 = sshll.u32 %s745_s22, 4  ;;  %s663_s27 = int_to_ptr.vmem [resolvable:$false] %s662_s27 }
  0x3f   : > { %s664_s6 = scalar_lea.vmem %s663_s27, 3072  ;;  %p665_p6 = scmp.lt.s32.totalorder %s869_s7, %s663_s27 }
  0x40   : > { %p660_p5 = pnand %p658_p4, %p644_p12  ;;  %p666_p13 = scmp.lt.s32.totalorder %s664_s6, %s657_s30 }
  0x42   : > { %p661_p0 = pneg %p660_p5  ;;  %p667_p7 = por %p666_p13, %p665_p6 }
  0x44   : > { %p668_p3 = pnand %p667_p7, %p661_p0 }
  0x46   : > { %671 = shalt.err (!%p668_p3)
}
  0x47   : > { %s746_s8 = smov 768   ;;  %s747_s9 = smov 48  }
  0x48   : > { %564 = dma.hbm_to_vmem [thread:$0]  (!%p1035_p11), %s874_s10, 1536, %s869_s7, %s876_s29, %s746_s8, %s746_s8, %s747_s9  }
  0x49   : > { %p1036_p12 = scmp.ne.s32.totalorder %s1031_s26, 0 }
  0x4a   : > { %s907_s11 = sand.u32 (!%p1036_p12), 1, %s734_s13   ;;  %p1037_p1 = scmp.ne.s32.totalorder (!%p1036_p12), %s1028_s23, 0 }
  0x4b   : > { %170 = sbr.rel (%p1036_p12) target bundleno = 441 (0x1b9), region = 32  ;;  %s173_s5 = scalar_lea.sflag (!%p1036_p12), [#allocation3], %s907_s11 }
  0x4c   : > { %s546_s28 = smul.u32 (!%p1036_p12), 96, %s907_s11 }
  0x4e   : > { %s176_s17 = scalar_lea.vmem (!%p1036_p12), [#allocation2], %s546_s28 }
  0x52   : > { %717 = dma.done.wait (%p1037_p1), %s173_s5, 1536  }
  0x53   : > { %719 = vsyncadd (%p1037_p1), %s173_s5, 4294965760  ;;  %p1038_p8 = scmp.eq.s32.totalorder %s792_s16, 0 }
  0x55   : > { %721 = dma.done.wait (%p1038_p8), [#allocation6], 96   ;;  %p1039_p11 = pmov %p1038_p8 }
  0x56   : > { %v205_v0 = vld [vmem:[%s176_s17] sm:$0xff]  ;;  %v206_v1 = vld [vmem:[%s176_s17 + $0x8] sm:$0xff]  ;;  %v207_v2 = vld [vmem:[%s176_s17 + $0x10] sm:$0xff]  ;;  %v292_v62 = vlaneseq  ;;  %s547_s4 = smul.u32 48, %s907_s11  ;;  %s421_s30 = scalar_lea.sflag [#allocation4], %s907_s11 }
  0x57   : > { %723 = vsyncadd (%p1039_p11), [#allocation6], 4294967200  ;;  %v208_v3 = vld [vmem:[%s176_s17 + $0x18] sm:$0xff]  ;;  %v217_v4 = vadd.f32 %v206_v1, %v205_v0  ;;  %v211_v5 = vld [vmem:[%s176_s17 + $0x30] sm:$0xff]  ;;  %s548_s7 = smul.u32 768, %s792_s16  ;;  %p1040_p10 = scmp.ne.s32.totalorder %s1029_s24, 0 }
  0x58   : > { %v212_v6 = vld [vmem:[%s176_s17 + $0x38] sm:$0xff]  ;;  %v213_v7 = vld [vmem:[%s176_s17 + $0x40] sm:$0xff]  ;;  %v214_v11 = vld [vmem:[%s176_s17 + $0x48] sm:$0xff]  ;;  %s202_s10 = scalar_lea.vmem [#allocation7], %s547_s4  ;;  %s748_s27 = smov [#allocation7]  }
  0x59   : > { %v218_v8 = vadd.f32 %v217_v4, %v207_v2  ;;  %v224_v9 = vadd.f32 %v212_v6, %v211_v5  ;;  %v209_v10 = vld [vmem:[%s176_s17 + $0x20] sm:$0xff]  ;;  %v210_v14 = vld [vmem:[%s176_s17 + $0x28] sm:$0xff]  ;;  %v215_v15 = vld [vmem:[%s176_s17 + $0x50] sm:$0xff]  ;;  %s435_s29 = sshll.u32 %s202_s10, 4  ;;  %s972_s20 = scalar_lea.hbm %s1021_s3, %s548_s7  ;;  %s974_s29 = int_to_ptr.vmem [resolvable:$true] %s435_s29 }
  0x5a   : > { %v216_v18 = vld [vmem:[%s176_s17 + $0x58] sm:$0xff]  ;;  %s672_s22 = scalar_lea.vmem %s974_s29, 768  ;;  %s676_s6 = sshll.u32 %s748_s27, 4  ;;  %s677_s6 = int_to_ptr.vmem [resolvable:$false] %s676_s6 }
  0x5b   : > { %v219_v12 = vadd.f32 %v218_v8, %v208_v3  ;;  %v225_v13 = vadd.f32 %v224_v9, %v213_v7  ;;  %v290_v8 = vld [vmem:[#allocation5] sm:$0x3f]  ;;  %p673_p9 = scmp.ne.s32.totalorder %s974_s29, %s672_s22  ;;  %s678_s8 = scalar_lea.vmem %s677_s6, 1536 }
  0x5c   : > { %p679_p5 = scmp.lt.s32.totalorder %s974_s29, %s677_s6  ;;  %p680_p0 = scmp.lt.s32.totalorder %s678_s8, %s672_s22 }
  0x5d   : > { %v220_v16 = vadd.f32 %v219_v12, %v209_v10  ;;  %v226_v17 = vadd.f32 %v225_v13, %v214_v11  ;;  %p674_p2 = pnand %p673_p9, %p1040_p10 }
  0x5e   : > { %p681_p6 = por %p680_p0, %p679_p5 }
  0x5f   : > { %v221_v19 = vadd.f32 %v220_v16, %v210_v14  ;;  %v227_v20 = vadd.f32 %v226_v17, %v215_v15  ;;  %p675_p4 = pneg %p674_p2 }
  0x61   : > { %222 = vadd.xlane.f32.xlu0 %v221_v19  ;;  %v228_v21 = vadd.f32 %v227_v20, %v216_v18  ;;  %p682_p13 = pnand %p681_p6, %p675_p4 }
  0x65   : > { %229 = vadd.xlane.f32.xlu0 %v228_v21 }
  0xee   : > { %v223_v22 = vpop.xlane.xlu0 %222 }
  0xef   : > { %v232_v23 = vmul.f32 0.0013020834, %v223_v22 }
  0xf1   : > { %v919_v24 = vsub.f32 %v205_v0, %v232_v23  ;;  %v921_v25 = vsub.f32 %v206_v1, %v232_v23  ;;  %v923_v26 = vsub.f32 %v207_v2, %v232_v23  ;;  %v925_v28 = vsub.f32 %v208_v3, %v232_v23 }
  0xf2   : > { %v230_v27 = vpop.xlane.xlu0 %229  ;;  %v238_v32 = vsub.f32 %v209_v10, %v232_v23  ;;  %v239_v38 = vsub.f32 %v210_v14, %v232_v23  ;;  %v293_v2 = vshrl.u32 %v292_v62, 7 }
  0xf3   : > { %v233_v29 = vmul.f32 0.0013020834, %v230_v27  ;;  %v246_v30 = vmul.f32 %v919_v24, %v919_v24  ;;  %v247_v31 = vmul.f32 %v921_v25, %v921_v25  ;;  %v248_v33 = vmul.f32 %v923_v26, %v923_v26 }
  0xf4   : > { %v249_v39 = vmul.f32 %v925_v28, %v925_v28  ;;  %v250_v44 = vmul.f32 %v238_v32, %v238_v32  ;;  %v251_v49 = vmul.f32 %v239_v38, %v239_v38  ;;  %v294_v4 = vsub.s32 0, %v293_v2 }
  0xf5   : > { %v258_v34 = vadd.f32 %v247_v31, %v246_v30  ;;  %v933_v35 = vsub.f32 %v211_v5, %v233_v29  ;;  %v935_v36 = vsub.f32 %v212_v6, %v233_v29  ;;  %v937_v37 = vsub.f32 %v213_v7, %v233_v29 }
  0xf6   : > { %v941_v41 = vsub.f32 %v214_v11, %v233_v29  ;;  %v947_v46 = vsub.f32 %v215_v15, %v233_v29  ;;  %v245_v51 = vsub.f32 %v216_v18, %v233_v29  ;;  %v298_v5 = vsub.s32 1, %v293_v2  ;;  %v334_v11 = vld [vmem:[%s1020_s2] sm:$0x3f] }
  0xf7   : > { %v259_v40 = vadd.f32 %v258_v34, %v248_v33  ;;  %v252_v42 = vmul.f32 %v933_v35, %v933_v35  ;;  %v253_v43 = vmul.f32 %v935_v36, %v935_v36  ;;  %v254_v47 = vmul.f32 %v937_v37, %v937_v37 }
  0xf8   : > { %v255_v52 = vmul.f32 %v941_v41, %v941_v41  ;;  %v256_v55 = vmul.f32 %v947_v46, %v947_v46  ;;  %v257_v57 = vmul.f32 %v245_v51, %v245_v51  ;;  %v302_v6 = vsub.s32 2, %v293_v2 }
  0xf9   : > { %v260_v45 = vadd.f32 %v259_v40, %v249_v39  ;;  %v265_v48 = vadd.f32 %v253_v43, %v252_v42  ;;  %v306_v7 = vsub.s32 3, %v293_v2  ;;  %v310_v9 = vsub.s32 4, %v293_v2 }
  0xfa   : > { %v314_v10 = vsub.s32 5, %v293_v2  ;;  %v295_v12 = vrot.slane %v290_v8, %v294_v4  ;;  %v299_v13 = vrot.slane %v290_v8, %v298_v5  ;;  %v303_v14 = vrot.slane %v290_v8, %v302_v6 }
  0xfb   : > { %v261_v50 = vadd.f32 %v260_v45, %v250_v44  ;;  %v266_v53 = vadd.f32 %v265_v48, %v254_v47  ;;  %v307_v15 = vrot.slane %v290_v8, %v306_v7  ;;  %v311_v17 = vrot.slane %v290_v8, %v310_v9 }
  0xfc   : > { %v315_v18 = vrot.slane %v290_v8, %v314_v10  ;;  %v339_v19 = vrot.slane %v334_v11, %v294_v4  ;;  %v343_v20 = vrot.slane %v334_v11, %v298_v5  ;;  %v347_v31 = vrot.slane %v334_v11, %v302_v6 }
  0xfd   : > { %v262_v54 = vadd.f32 %v261_v50, %v251_v49  ;;  %v267_v56 = vadd.f32 %v266_v53, %v255_v52  ;;  %v351_v33 = vrot.slane %v334_v11, %v306_v7  ;;  %v355_v40 = vrot.slane %v334_v11, %v310_v9 }
  0xfe   : > { %v359_v42 = vrot.slane %v334_v11, %v314_v10 }
  0xff   : > { %263 = vadd.xlane.f32.xlu1 %v262_v54  ;;  %v268_v58 = vadd.f32 %v267_v56, %v256_v55 }
 0x101   : > { %v269_v59 = vadd.f32 %v268_v58, %v257_v57 }
 0x103   : > { %270 = vadd.xlane.f32.xlu1 %v269_v59 }
 0x18c   : > { %v264_v60 = vpop.xlane.xlu1 %263 }
 0x18d   : > { %v272_v61 = vmul.f32 0.0013020834, %v264_v60 }
 0x18f   : > { %v274_v63 = vadd.f32 1e-12, %v272_v61 }
 0x190   : > { %v271_v0 = vpop.xlane.xlu1 %270 }
 0x191   : > { %610 = vrsqrt.f32 %v274_v63  ;;  %v273_v1 = vmul.f32 0.0013020834, %v271_v0 }
 0x193   : > { %v275_v3 = vadd.f32 1e-12, %v273_v1 }
 0x195   : > { %612 = vrsqrt.f32 %v275_v3 }
 0x19b   : > { %v611_v16 = vpop.eup %610 }
 0x19c   : > { %v278_v21 = vmul.f32 %v611_v16, %v919_v24  ;;  %v279_v22 = vmul.f32 %v611_v16, %v921_v25  ;;  %v280_v23 = vmul.f32 %v611_v16, %v923_v26  ;;  %v281_v27 = vmul.f32 %v611_v16, %v925_v28 }
 0x19d   : > { %v282_v29 = vmul.f32 %v611_v16, %v238_v32  ;;  %v283_v30 = vmul.f32 %v611_v16, %v239_v38 }
 0x19e   : > { %v322_v34 = vmul.f32 %v295_v12, %v278_v21  ;;  %v323_v39 = vmul.f32 %v299_v13, %v279_v22  ;;  %v324_v44 = vmul.f32 %v303_v14, %v280_v23  ;;  %v325_v45 = vmul.f32 %v307_v15, %v281_v27 }
 0x19f   : > { %v613_v43 = vpop.eup %612  ;;  %v326_v24 = vmul.f32 %v311_v17, %v282_v29  ;;  %v327_v47 = vmul.f32 %v315_v18, %v283_v30 }
 0x1a0   : > { %v284_v25 = vmul.f32 %v613_v43, %v933_v35  ;;  %v285_v26 = vmul.f32 %v613_v43, %v935_v36  ;;  %v286_v28 = vmul.f32 %v613_v43, %v937_v37  ;;  %v287_v32 = vmul.f32 %v613_v43, %v941_v41 }
 0x1a1   : > { %v288_v38 = vmul.f32 %v613_v43, %v947_v46  ;;  %v289_v48 = vmul.f32 %v613_v43, %v245_v51  ;;  %v366_v49 = vadd.f32 %v339_v19, %v322_v34  ;;  %v367_v50 = vadd.f32 %v343_v20, %v323_v39 }
 0x1a2   : > { %v328_v52 = vmul.f32 %v295_v12, %v284_v25  ;;  %v329_v53 = vmul.f32 %v299_v13, %v285_v26  ;;  %v330_v54 = vmul.f32 %v303_v14, %v286_v28  ;;  %v331_v55 = vmul.f32 %v307_v15, %v287_v32 }
 0x1a3   : > { %v332_v56 = vmul.f32 %v311_v17, %v288_v38  ;;  %v333_v57 = vmul.f32 %v315_v18, %v289_v48  ;;  %v368_v58 = vadd.f32 %v347_v31, %v324_v44  ;;  %v369_v35 = vadd.f32 %v351_v33, %v325_v45 }
 0x1a4   : > { %v370_v59 = vadd.f32 %v355_v40, %v326_v24  ;;  %v371_v36 = vadd.f32 %v359_v42, %v327_v47  ;;  %v372_v60 = vadd.f32 %v339_v19, %v328_v52  ;;  %v373_v37 = vadd.f32 %v343_v20, %v329_v53 }
 0x1a5   : > { %v374_v41 = vadd.f32 %v347_v31, %v330_v54  ;;  %v375_v46 = vadd.f32 %v351_v33, %v331_v55  ;;  %v376_v51 = vadd.f32 %v355_v40, %v332_v56  ;;  %v377_v61 = vadd.f32 %v359_v42, %v333_v57 }
 0x1a6   : > { %v538_v62 = vpack.c.bf16 %v367_v50, %v366_v49  ;;  %v539_v63 = vpack.c.bf16 %v369_v35, %v368_v58  ;;  %v540_v0 = vpack.c.bf16 %v371_v36, %v370_v59  ;;  %v541_v1 = vpack.c.bf16 %v373_v37, %v372_v60 }
 0x1a7   : > { %v542_v2 = vpack.c.bf16 %v375_v46, %v374_v41  ;;  %v543_v3 = vpack.c.bf16 %v377_v61, %v376_v51 }
 0x1a8   : > { %414 = vst [vmem:[%s202_s10] sm:$0xff] %v538_v62  ;;  %415 = vst [vmem:[%s202_s10 + $0x8] sm:$0xff] %v539_v63 }
 0x1a9   : > { %416 = vst [vmem:[%s202_s10 + $0x10] sm:$0xff] %v540_v0  ;;  %417 = vst [vmem:[%s202_s10 + $0x18] sm:$0xff] %v541_v1 }
 0x1aa   : > { %418 = vst [vmem:[%s202_s10 + $0x20] sm:$0xff] %v542_v2  ;;  %419 = vst [vmem:[%s202_s10 + $0x28] sm:$0xff] %v543_v3 }
 0x1ab   : > { %685 = shalt.err (!%p682_p13)
}
 0x1ac   : > { %s686_s9 = scalar_lea.hbm %s972_s20, 768  ;;  %s690_s17 = scalar_lea.hbm %s1021_s3, 1536 }
 0x1ad   : > { %p687_p7 = scmp.ne.s32.totalorder %s972_s20, %s686_s9  ;;  %p691_p1 = scmp.lt.u32.totalorder %s972_s20, %s1021_s3 }
 0x1ae   : > { %p692_p8 = scmp.lt.u32.totalorder %s690_s17, %s686_s9  ;;  %p694_p9 = scmp.lt.u32.totalorder %s686_s9, %s972_s20 }
 0x1af   : > { %p688_p3 = pnand %p687_p7, %p1040_p10 }
 0x1b0   : > { %p693_p11 = por %p692_p8, %p691_p1 }
 0x1b1   : > { %p689_p12 = pneg %p688_p3 }
 0x1b2   : > { %p695_p2 = por %p694_p9, %p693_p11 }
 0x1b4   : > { %p696_p4 = pnand %p695_p2, %p689_p12 }
 0x1b6   : > { %699 = shalt.err (!%p696_p4)
}
 0x1b7   : > { %s749_s4 = smov 384   ;;  %s750_s7 = smov 24  }
 0x1b8   : > { %555 = dma.vmem_to_hbm [thread:$0]  (%p1040_p10), %s974_s29, 768, %s972_s20, %s421_s30, %s749_s4, %s749_s4, %s750_s7  }
 0x1b9 PF: > { %s450_s10 = sand.u32 1, %s730_s12   ;;  %p1041_p5 = scmp.ne.s32.totalorder %s1030_s25, 0 }
 0x1ba   : > { %p1042_p0 = scmp.ge.s32.totalorder %s742_s15, 2  ;;  %s451_s16 = scalar_lea.sflag [#allocation4], %s450_s10 }
 0x1bc   : > { %p566_p6 = pnand %p1042_p0, %p1041_p5 }
 0x1be   : > { %725 = dma.done.wait (!%p566_p6), %s451_s16, 768  }
 0x1bf   : > { %727 = vsyncadd (!%p566_p6), %s451_s16, 4294966528  ;;  %p17_p13 = scmp.ge.s32.totalorder %s796_s18, 4   ;;  %s1043_s12 = smov %s734_s13 }
 0x1c0   : > { %s1044_s13 = smov %s738_s14  ;;  %s1045_s14 = smov %s808_s21 }
 0x1c1   : > { %s1046_s15 = smov %s796_s18  ;;  %19 = sbr.rel (!%p17_p13) target bundleno = 6 (0x6), region = 81 }
 0x1c8   :  { %456 = vsyncpa [#allocation3], 1 }
 0x1c9   :  { %458 = vsyncpa [#allocation3 + $0x1], 1 }
 0x1ca   :  { %459 = vsyncpa [#allocation6], 1 }
 0x1cb   :  { %460 = vsyncpa [#allocation4], 1 }
 0x1cc   :  { %462 = vsyncpa [#allocation4 + $0x1], 1 }

</bundles_post_ra>
